<compile_context>
chip_gen: v7x
topology: tpu7x:2x2x1
jax: 0.10.0
libtpu: 0.0.40
codegen_flags: <defaults>
</compile_context>

<pallas_src>
import jax
import jax.numpy as jnp
from jax.experimental import pallas as pl
from jax.experimental.pallas import tpu as pltpu


def mlp_kernel(x_ref, w1_ref, w2_ref, out_ref):
    # w*_ref hold the weight matrix with the bias appended as the LAST row:
    #   w1_ref: (F+1, H)   rows [0:F] = W1, row F = b1
    #   w2_ref: (H+1, O)   rows [0:H] = W2, row H = b2
    F = w1_ref.shape[0] - 1
    H = w2_ref.shape[0] - 1

    # hidden = relu(X @ W1 + b1)  -- MXU matmul, f32 accumulation
    h = jnp.dot(x_ref[...], w1_ref[0:F, :], preferred_element_type=jnp.float32)
    h = jnp.maximum(h + w1_ref[F:F + 1, :], 0.0)          # (B,H) + (1,H)

    # out = sigmoid(H @ W2 + b2)
    o = jnp.dot(h, w2_ref[0:H, :], preferred_element_type=jnp.float32)
    o = o + w2_ref[H:H + 1, :]                             # (B,O) + (1,O)
    out_ref[...] = jax.nn.sigmoid(o).astype(out_ref.dtype)


def prepare_params(w1, b1, w2, b2):
    """Fold each bias into its weight matrix as an extra final row (done once)."""
    w1_aug = jnp.concatenate([w1, b1.reshape(1, -1)], axis=0)   # (F+1, H)
    w2_aug = jnp.concatenate([w2, b2.reshape(1, -1)], axis=0)   # (H+1, O)
    return w1_aug, w2_aug


def mlp_forward(x, w1_aug, w2_aug):
    B = x.shape[0]
    F = w1_aug.shape[0] - 1
    H = w1_aug.shape[1]
    O = w2_aug.shape[1]

    flops = 2 * B * F * H + 2 * B * H * O
    bytes_accessed = 4 * (x.size + w1_aug.size + w2_aug.size + B * O)

    # Gridless call: every operand is a full-array block resident in VMEM.
    return pl.pallas_call(
        mlp_kernel,
        out_shape=jax.ShapeDtypeStruct((B, O), x.dtype),
        in_specs=[
            pl.BlockSpec(memory_space=pltpu.MemorySpace.VMEM),
            pl.BlockSpec(memory_space=pltpu.MemorySpace.VMEM),
            pl.BlockSpec(memory_space=pltpu.MemorySpace.VMEM),
        ],
        out_specs=pl.BlockSpec(memory_space=pltpu.MemorySpace.VMEM),
        cost_estimate=pl.CostEstimate(
            flops=flops,
            transcendentals=B * O,          # sigmoid exp per output element
            bytes_accessed=bytes_accessed,
        ),
    )(x, w1_aug, w2_aug)


if __name__ == "__main__":
    # Model(n_features=32, n_neurons=64, n_out=16), batch=8
    B, F, H, O = 8, 32, 64, 16
    key = jax.random.PRNGKey(0)
    kx, k1, kb1, k2, kb2 = jax.random.split(key, 5)

    x = jax.random.normal(kx, (B, F), dtype=jnp.float32)
    # Deterministic "Linear" params; stored as (in, out) so the kernel does X @ W.
    w1 = jax.random.normal(k1, (F, H), dtype=jnp.float32) * 0.1
    b1 = jax.random.normal(kb1, (1, H), dtype=jnp.float32) * 0.1
    w2 = jax.random.normal(k2, (H, O), dtype=jnp.float32) * 0.1
    b2 = jax.random.normal(kb2, (1, O), dtype=jnp.float32) * 0.1

    # One-time weight packing (kept resident / reused across calls by the caller).
    w1_aug, w2_aug = prepare_params(w1, b1, w2, b2)

    fwd = jax.jit(mlp_forward)
    out = fwd(x, w1_aug, w2_aug)
    jax.block_until_ready(out)

    # Reference check in plain JAX
    ref = jax.nn.sigmoid(jnp.maximum(x @ w1 + b1, 0.0) @ w2 + b2)
    assert out.shape == (B, O)
    assert jnp.allclose(out, ref, atol=1e-5), "mismatch vs reference"
    print("KERNEL_OK")
</pallas_src>

<mosaic_0001>
module attributes {stable_mosaic.version = 11 : i64} {
  func.func @mlp_kernel(%arg0: memref<8x32xf32, #tpu.memory_space<vmem>>, %arg1: memref<33x64xf32, #tpu.memory_space<vmem>>, %arg2: memref<65x16xf32, #tpu.memory_space<vmem>>, %arg3: memref<8x16xf32, #tpu.memory_space<vmem>>) attributes {dimension_semantics = [], scalar_prefetch = 0 : i64, scratch_operands = 0 : i64, tpu.core_type = #tpu.core_type<tc>} {
    %c0 = arith.constant 0 : index
    %c0_0 = arith.constant 0 : index
    %0 = vector.load %arg0[%c0, %c0_0] : memref<8x32xf32, #tpu.memory_space<vmem>>, vector<8x32xf32>
    %c0_1 = arith.constant 0 : index
    %c0_2 = arith.constant 0 : index
    %1 = vector.load %arg1[%c0_1, %c0_2] : memref<33x64xf32, #tpu.memory_space<vmem>>, vector<32x64xf32>
    %cst = arith.constant dense<0.000000e+00> : vector<8x64xf32>
    %2 = tpu.matmul %0, %1, %cst {dimension_numbers = #tpu.dot_dimension_numbers<[1], [0], [0], [1], [0, 0, 1, 1], [], []>} : vector<8x32xf32>, vector<32x64xf32>, vector<8x64xf32> -> vector<8x64xf32>
    %c32 = arith.constant 32 : index
    %c0_3 = arith.constant 0 : index
    %3 = vector.load %arg1[%c32, %c0_3] : memref<33x64xf32, #tpu.memory_space<vmem>>, vector<1x64xf32>
    %4 = vector.broadcast %3 : vector<1x64xf32> to vector<8x64xf32>
    %5 = arith.addf %2, %4 : vector<8x64xf32>
    %cst_4 = arith.constant 0.000000e+00 : f32
    %6 = vector.broadcast %cst_4 : f32 to vector<8x64xf32>
    %7 = arith.maximumf %5, %6 : vector<8x64xf32>
    %c0_5 = arith.constant 0 : index
    %c0_6 = arith.constant 0 : index
    %8 = vector.load %arg2[%c0_5, %c0_6] : memref<65x16xf32, #tpu.memory_space<vmem>>, vector<64x16xf32>
    %cst_7 = arith.constant dense<0.000000e+00> : vector<8x16xf32>
    %9 = tpu.matmul %7, %8, %cst_7 {dimension_numbers = #tpu.dot_dimension_numbers<[1], [0], [0], [1], [0, 0, 1, 1], [], []>} : vector<8x64xf32>, vector<64x16xf32>, vector<8x16xf32> -> vector<8x16xf32>
    %c64 = arith.constant 64 : index
    %c0_8 = arith.constant 0 : index
    %10 = vector.load %arg2[%c64, %c0_8] : memref<65x16xf32, #tpu.memory_space<vmem>>, vector<1x16xf32>
    %11 = vector.broadcast %10 : vector<1x16xf32> to vector<8x16xf32>
    %12 = arith.addf %9, %11 : vector<8x16xf32>
    %13 = arith.negf %12 : vector<8x16xf32>
    %14 = math.exp %13 : vector<8x16xf32>
    %cst_9 = arith.constant 1.000000e+00 : f32
    %15 = vector.broadcast %cst_9 : f32 to vector<8x16xf32>
    %16 = arith.addf %15, %14 : vector<8x16xf32>
    %17 = arith.divf %15, %16 : vector<8x16xf32>
    %c0_10 = arith.constant 0 : index
    %c0_11 = arith.constant 0 : index
    %18 = vector.load %arg3[%c0_10, %c0_11] : memref<8x16xf32, #tpu.memory_space<vmem>>, vector<8x16xf32>
    tpu.vector_store %arg3[%c0_10, %c0_11], %17 {strides = array<i32>} : memref<8x16xf32, #tpu.memory_space<vmem>>, vector<8x16xf32>,
    return
  }
}

</mosaic_0001>

<bundles_post_ra>
// kernel: mlp_forward.1
= control target key start
LH: loop header
LB: loop body
LE: loop exit
PB: predicated region body
PF: predicated region fallthrough
CT: control target
= control target key end

     0   :  { %v308_v3 = vmov 0.0|0.0   ;;  %vm309_vm0 = vmmov 0   ;;  %v310_v6 = vmov 0.0   ;;  %s389_s0 = inlined_call_operand.vmem [shape: f32[8,32], index: 0, kind: input, shape index: {}]   ;;  %s390_s1 = inlined_call_operand.vmem [shape: f32[33,64], index: 1, kind: input, shape index: {}]   ;;  %s391_s2 = inlined_call_operand.vmem [shape: f32[65,16], index: 2, kind: input, shape index: {}]   ;;  %s392_s3 = inlined_call_operand.hbm [shape: f32[8,16], index: 3, kind: output, shape index: {}]  }
   0x1   :  { %v16_v0 = vld [vmem:[%s390_s1] sm:$0xff]  ;;  %v17_v1 = vld [vmem:[%s390_s1 + $0x8] sm:$0xff]  ;;  %v18_v2 = vld [vmem:[%s390_s1 + $0x10] sm:$0xff]  ;;  %258 = vmatprep.subr.bf16.mxu0 %v308_v3  ;;  %236 = vmatprep.mubr.msk.f32.mxu0 %vm309_vm0, %v310_v6 }
   0x2   :  { %v259_v4 = vpack.c.bf16 %v17_v1, %v16_v0  ;;  %v19_v5 = vld [vmem:[%s390_s1 + $0x18] sm:$0xff]  ;;  %v100_v7 = vld [vmem:[%s391_s2] sm:$0xff]  ;;  %264 = vmatprep.subr.bf16.mxu1 %v308_v3  ;;  %v101_v8 = vld [vmem:[%s391_s2 + $0x8] sm:$0xff]  ;;  %255 = vmatprep.mubr.msk.f32.mxu1 %vm309_vm0, %v310_v6 }
   0x3   :  { %v102_v9 = vld [vmem:[%s391_s2 + $0x10] sm:$0xff]  ;;  %v103_v10 = vld [vmem:[%s391_s2 + $0x18] sm:$0xff]  ;;  %v262_v11 = vpack.c.bf16 %v19_v5, %v18_v2  ;;  %v265_v12 = vpack.c.bf16 %v101_v8, %v100_v7 }
   0x4   :  { %260 = vmatpush3.bf16.msra.mxu0 %v259_v4 }
   0x5   :  { %261 = vmatprep.subr.bf16.mxu0 %v308_v3 }
   0x6   :  { %8 = vsyncpa [#allocation3], 0  ;;  %266 = vmatpush3.bf16.msra.mxu1 %v265_v12  ;;  %v268_v13 = vpack.c.bf16 %v103_v10, %v102_v9  ;;  %v104_v14 = vld [vmem:[%s391_s2 + $0x20] sm:$0xff]  ;;  %v105_v15 = vld [vmem:[%s391_s2 + $0x28] sm:$0xff]  ;;  %vm25_vm1 = vcmask 261120   ;;  %vm113_vm2 = vcmask 523264  }
   0x7   :  { %267 = vmatprep.subr.bf16.mxu1 %v308_v3  ;;  %v15_v16 = vld [vmem:[%s389_s0] sm:$0xff]  ;;  %v271_v17 = vpack.c.bf16 %v105_v15, %v104_v14  ;;  %v106_v18 = vld [vmem:[%s391_s2 + $0x30] sm:$0xff]  ;;  %v107_v19 = vld [vmem:[%s391_s2 + $0x38] sm:$0xff]  ;;  %s311_s14 = smov [#allocation2]   ;;  %vm193_vm3 = vcmask 130048  }
   0x8   :  { %263 = vmatpush3.bf16.msra.mxu0 %v262_v11  ;;  %v274_v20 = vpack.c.bf16 %v107_v19, %v106_v18  ;;  %v209_v21 = vld [vmem:[%s390_s1 + $0x20] ss:$0 sm:$0xff]  ;;  %s201_s1 = sshll.u32 %s311_s14, 4  ;;  %s202_s1 = int_to_ptr.vmem [resolvable:$true] %s201_s1 }
   0x9   :  { %v211_v26 = vld [vmem:[%s391_s2 + $0x40] ss:$0 sm:$0xff]  ;;  %s284_s15 = scalar_lea.vmem %s202_s1, 128  ;;  %p289_p1 = scmp.lt.s32.totalorder %s202_s1, %s202_s1 }
   0xa   :  { %269 = vmatpush3.bf16.msra.mxu1 %v268_v13  ;;  %p285_p0 = scmp.ne.s32.totalorder %s202_s1, %s284_s15  ;;  %p290_p2 = scmp.lt.s32.totalorder %s284_s15, %s284_s15 }
   0xb   :  { %237 = vmatmul.mubr.msk.f32.vlgmr.msra.gmra.mrb[0].mxu0 %vm25_vm1, %v15_v16  ;;  %270 = vmatprep.subr.bf16.mxu1 %v308_v3 }
   0xc   :  { %p291_p3 = por %p290_p2, %p289_p1 }
   0xe   :  { %272 = vmatpush3.bf16.msra.mxu1 %v271_v17  ;;  %p292_p4 = pnand %p291_p3, %p285_p0 }
   0xf   :  { %273 = vmatprep.subr.bf16.mxu1 %v308_v3 }
  0x12   :  { %275 = vmatpush3.bf16.msra.mxu1 %v274_v20 }
  0xde   :  { %v95_v22 = vpop.f32.mrb[0].mxu0 }
  0xdf   :  { %v96_v23 = vadd.f32 %v209_v21, %v95_v22  ;;  %v238_v24 = vpop.f32.mrb[1].mxu0 }
  0xe1   :  { %v99_v25 = vmax.f32 %v96_v23, 0.0 }
  0xe3   :  { %256 = vmatmul.mubr.msk.f32.vlgmr.msra.gmra.mrb[0].mxu1 %vm113_vm2, %v99_v25 }
 0x1b6   :  { %v183_v27 = vpop.f32.mrb[0].mxu1 }
 0x1b7   :  { %v184_v28 = vadd.f32 %v211_v26, %v183_v27  ;;  %v257_v29 = vpop.f32.mrb[1].mxu1 }
 0x1b9   :  { %v213_v30 = vmul.f32 -1.442695, %v184_v28 }
 0x1bb   :  { %280 = vpow2.f32 %v213_v30 }
 0x1c5   :  { %v281_v31 = vpop.eup %280 }
 0x1c6   :  { %v190_v32 = vadd.f32 1.0, %v281_v31 }
 0x1c8   :  { %282 = vrcp.f32 %v190_v32 }
 0x1d2   :  { %v283_v33 = vpop.eup %282 }
 0x1d3   :  { %194 = vst.msk [vmem:[#allocation2] sm:$0xff] %vm193_vm3, %v283_v33 }
 0x1d4   :  { %295 = shalt.err (!%p292_p4)
}
 0x1d5   :  { %s296_s17 = scalar_lea.hbm %s392_s3, 128 }
 0x1d6   :  { %p297_p5 = scmp.ne.s32.totalorder %s392_s3, %s296_s17  ;;  %p300_p6 = scmp.lt.u32.totalorder %s296_s17, %s392_s3 }
 0x1d8   :  { %p302_p7 = pnand %p300_p6, %p297_p5 }
 0x1da   :  { %305 = shalt.err (!%p302_p7)
}
 0x1db   :  { %204 = dma.vmem_to_hbm [thread:$0]  %s202_s1, 128, %s392_s3, [#allocation3]  }
 0x1dc   :  { %306 = dma.done.wait [#allocation3], 128  }
 0x1dd   :  { %307 = vsyncadd [#allocation3], 4294967168 }
 0x1de   :  { %208 = vsyncpa [#allocation3], 1 }

</bundles_post_ra>
